<compile_context>
chip_gen: v7x
topology: tpu7x:2x2x1
jax: 0.10.0
libtpu: 0.0.40
codegen_flags: <defaults>
</compile_context>

<pallas_src>
import functools

import jax
import jax.numpy as jnp
from jax.experimental import pallas as pl
from jax.experimental.pallas import tpu as pltpu

ALPHA = -0.5
BETA = -0.5


def _jacobi_abc(i, a, b):
    A = (2 * i + a + b - 1) * (2 * i + a + b) / (2 * i * (i + a + b))
    B = ((2 * i + a + b - 1) * (a ** 2 - b ** 2)
         / (2 * i * (i + a + b) * (2 * i + a + b - 2)))
    C = (-2 * (i + a - 1) * (i + b - 1) * (2 * i + a + b)
         / (2 * i * (i + a + b) * (2 * i + a + b - 2)))
    return A, B, C


def _jacobi_kan_kernel(x_ref, w_ref, y_ref, p_ref, *,
                       degree, input_dim, i_pad, a, b):
    # x_ref: (1, I, TN)      input block, num_points on the lane axis
    # w_ref: (O, K_pad)      fused weights, w[o, d*I_pad + i] = coeffs[i, o, d]
    # y_ref: (1, O, TN)      output block (lane-dense stores)
    # p_ref: (K_pad, TN)     VMEM scratch holding all polynomial blocks
    x = jnp.tanh(x_ref[0].astype(jnp.float32))                    # (I, TN)
    if i_pad != input_dim:
        # Sublane-align every degree block. Padded rows are tanh(0)=0, so the
        # recurrence stays finite; the matching w_flat columns are zero.
        pad = jnp.zeros((i_pad - input_dim, x.shape[1]), jnp.float32)
        x = jnp.concatenate([x, pad], axis=0)                      # (I_pad, TN)

    dt = p_ref.dtype
    p_prev = jnp.ones_like(x)                                      # P0
    p_ref[0:i_pad, :] = p_prev.astype(dt)
    if degree > 0:
        p_curr = (a - b + (a + b + 2.0) * x) * 0.5                 # P1
        p_ref[i_pad:2 * i_pad, :] = p_curr.astype(dt)
        for i in range(2, degree + 1):
            A, B, C = _jacobi_abc(i, a, b)
            p_next = (A * x + B) * p_curr + C * p_prev
            p_ref[i * i_pad:(i + 1) * i_pad, :] = p_next.astype(dt)
            p_prev, p_curr = p_curr, p_next

    # One fused MXU contraction over K_pad = (degree+1) * I_pad.
    y = jnp.dot(w_ref[...], p_ref[...], preferred_element_type=jnp.float32)
    y_ref[0] = y.astype(y_ref.dtype)                               # (O, TN)


def _choose_tiling(num_points, batch, cap_points, min_grid=4):
    """Pick (n_tiles, tile_n): tile_n multiple of 128, <= cap_points,
    minimal padded waste, and (when possible) >= min_grid total grid steps
    (2 steps per TensorCore on v7x's 2-core chips)."""
    blocks = -(-num_points // 128)
    cap_blocks = max(1, cap_points // 128)
    padded128 = blocks * 128
    candidates = []
    for n_tiles in range(1, blocks + 1):
        tile_blocks = -(-blocks // n_tiles)
        if tile_blocks > cap_blocks:
            continue
        tile_n = tile_blocks * 128
        n_real = -(-blocks // tile_blocks)
        waste = n_real * tile_n - padded128
        meets = (batch * n_real) >= min_grid
        # rank: prefer enough grid steps, then minimal wasted work, then big tiles
        candidates.append((0 if meets else 1, waste, -tile_n, n_real, tile_n))
    candidates.sort()
    _, _, _, n_tiles, tile_n = candidates[0]
    return n_tiles, tile_n


def jacobi_kan_forward(x, coeffs, degree, a=ALPHA, b=BETA, *,
                       max_tile_n=2048, matmul_dtype=jnp.float32,
                       out_dtype=None, vmem_budget_bytes=24 * 1024 * 1024):
    """x: (batch, input_dim, num_points), coeffs: (input_dim, output_dim, degree+1)."""
    batch, input_dim, num_points = x.shape
    output_dim = coeffs.shape[1]
    out_dtype = x.dtype if out_dtype is None else out_dtype

    mm_size = jnp.dtype(matmul_dtype).itemsize
    sublane = 8 * (4 // max(1, mm_size))          # 8 rows (f32) / 16 rows (bf16)
    i_pad = -(-input_dim // sublane) * sublane
    k_pad = i_pad * (degree + 1)

    # Fused, sublane-aligned weight layout: w_flat[o, d*I_pad + i] = coeffs[i, o, d]
    w = jnp.transpose(coeffs, (1, 2, 0))                            # (O, D+1, I)
    if i_pad != input_dim:
        w = jnp.pad(w, ((0, 0), (0, 0), (0, i_pad - input_dim)))    # zero-fill pad cols
    w_flat = w.reshape(output_dim, k_pad).astype(matmul_dtype)

    # ---- VMEM-aware tile selection (budget keeps v7x's 64 MiB safe) ----
    x_size = jnp.dtype(x.dtype).itemsize
    o_size = jnp.dtype(out_dtype).itemsize
    w_bytes = output_dim * k_pad * mm_size
    single_buffer_w = w_bytes > (4 << 20)          # only bother when weights are big
    fixed_bytes = (1 if single_buffer_w else 2) * w_bytes + (1 << 20)
    per_point = (2 * input_dim * x_size            # double-buffered input block
                 + 2 * output_dim * o_size         # double-buffered output block
                 + k_pad * mm_size                 # polynomial scratch
                 + 4 * (4 * i_pad + output_dim))   # in-kernel f32 temporaries
    cap_points = max(0, vmem_budget_bytes - fixed_bytes) // per_point
    cap_points = max(128, (cap_points // 128) * 128)
    cap_points = min(max_tile_n, cap_points)
    n_tiles, tile_n = _choose_tiling(num_points, batch, cap_points)
    padded_n = n_tiles * tile_n

    if padded_n != num_points:
        x = jnp.pad(x, ((0, 0), (0, 0), (0, padded_n - num_points)))

    kernel = functools.partial(_jacobi_kan_kernel, degree=degree,
                               input_dim=input_dim, i_pad=i_pad,
                               a=float(a), b=float(b))

    w_spec_kwargs = {"pipeline_mode": pl.Buffered(1)} if single_buffer_w else {}
    vmem_limit = int(min(64 << 20,
                         max(32 << 20, 2 * (fixed_bytes + per_point * tile_n))))

    y = pl.pallas_call(
        kernel,
        out_shape=jax.ShapeDtypeStruct((batch, output_dim, padded_n), out_dtype),
        grid_spec=pltpu.PrefetchScalarGridSpec(
            num_scalar_prefetch=0,
            grid=(batch, n_tiles),
            in_specs=[
                pl.BlockSpec((1, input_dim, tile_n), lambda bi, ni: (bi, 0, ni)),
                pl.BlockSpec((output_dim, k_pad), lambda bi, ni: (0, 0),
                             **w_spec_kwargs),
            ],
            out_specs=pl.BlockSpec((1, output_dim, tile_n),
                                   lambda bi, ni: (bi, 0, ni)),
            scratch_shapes=[pltpu.VMEM((k_pad, tile_n), matmul_dtype)],
        ),
        compiler_params=pltpu.CompilerParams(
            dimension_semantics=("parallel", "parallel"),
            vmem_limit_bytes=vmem_limit),
    )(x, w_flat)

    if padded_n != num_points:
        y = y[:, :, :num_points]
    return y


def _reference_forward(x, coeffs, degree, a=ALPHA, b=BETA):
    """Pure-JAX reference mirroring the PyTorch forward exactly."""
    xt = jnp.tanh(jnp.transpose(x, (0, 2, 1)))            # (B, N, I)
    polys = [jnp.ones_like(xt)]
    if degree > 0:
        polys.append((a - b + (a + b + 2.0) * xt) / 2.0)
    for i in range(2, degree + 1):
        A, B, C = _jacobi_abc(i, a, b)
        polys.append((A * xt + B) * polys[-1] + C * polys[-2])
    jac = jnp.stack(polys, axis=-1)                        # (B, N, I, D+1)
    jac = jnp.transpose(jac, (0, 2, 3, 1))                 # (B, I, D+1, N)
    return jnp.einsum('bids,iod->bos', jac, coeffs)


if __name__ == "__main__":
    # Small shapes consistent with the module's forward.
    batch = 2
    input_dim = 4
    output_dim = 8
    num_points = 600     # not a multiple of 128 -> exercises the padded path
    degree = 3

    key = jax.random.PRNGKey(0)
    kx, kw = jax.random.split(key)
    x = jax.random.normal(kx, (batch, input_dim, num_points), dtype=jnp.float32)
    coeffs = (jax.random.normal(kw, (input_dim, output_dim, degree + 1),
                                dtype=jnp.float32)
              * (1.0 / (input_dim * (degree + 1))))

    y = jacobi_kan_forward(x, coeffs, degree)
    y = jax.block_until_ready(y)

    y_ref = _reference_forward(x, coeffs, degree)
    assert y.shape == (batch, output_dim, num_points)
    assert jnp.allclose(y, y_ref, atol=1e-5, rtol=1e-5), "mismatch vs reference"

    print("KERNEL_OK")
</pallas_src>

<mosaic_0001>
module attributes {stable_mosaic.version = 11 : i64} {
  func.func @_jacobi_kan_kernel(%arg0: i32, %arg1: i32, %arg2: memref<1x4x128xf32, #tpu.memory_space<vmem>>, %arg3: memref<8x32xf32, #tpu.memory_space<vmem>>, %arg4: memref<1x8x128xf32, #tpu.memory_space<vmem>>, %arg5: memref<32x128xf32, #tpu.memory_space<vmem>>) attributes {dimension_semantics = [#tpu.dimension_semantics<parallel>, #tpu.dimension_semantics<parallel>], iteration_bounds = array<i64: 2, 5>, scalar_prefetch = 0 : i64, scratch_operands = 1 : i64, tpu.core_type = #tpu.core_type<tc>, window_params = [{transform_indices = @transform_0, window_bounds = array<i64: 1, 4, 128>}, {pipeline_mode = #tpu.pipeline_mode<synchronous>, transform_indices = @transform_1, window_bounds = array<i64: 8, 32>}, {transform_indices = @transform_2, window_bounds = array<i64: 1, 8, 128>}]} {
    %c0 = arith.constant 0 : index
    %c0_0 = arith.constant 0 : index
    %c0_1 = arith.constant 0 : index
    %0 = vector.load %arg2[%c0, %c0_0, %c0_1] : memref<1x4x128xf32, #tpu.memory_space<vmem>>, vector<1x4x128xf32>
    %1 = vector.shape_cast %0 : vector<1x4x128xf32> to vector<4x128xf32>
    %2 = math.tanh %1 : vector<4x128xf32>
    %cst = arith.constant 0.000000e+00 : f32
    %3 = vector.broadcast %cst : f32 to vector<4x128xf32>
    %4 = tpu.concatenate %2, %3 in 0 : vector<4x128xf32>, vector<4x128xf32> -> vector<8x128xf32>
    %cst_2 = arith.constant 1.000000e+00 : f32
    %5 = vector.broadcast %cst_2 : f32 to vector<8x128xf32>
    %c0_3 = arith.constant 0 : index
    %c0_4 = arith.constant 0 : index
    %6 = vector.load %arg5[%c0_3, %c0_4] : memref<32x128xf32, #tpu.memory_space<vmem>>, vector<8x128xf32>
    tpu.vector_store %arg5[%c0_3, %c0_4], %5 {strides = array<i32>} : memref<32x128xf32, #tpu.memory_space<vmem>>, vector<8x128xf32>,
    %cst_5 = arith.constant 1.000000e+00 : f32
    %7 = vector.broadcast %cst_5 : f32 to vector<8x128xf32>
    %8 = arith.mulf %7, %4 : vector<8x128xf32>
    %cst_6 = arith.constant 0.000000e+00 : f32
    %9 = vector.broadcast %cst_6 : f32 to vector<8x128xf32>
    %10 = arith.addf %9, %8 : vector<8x128xf32>
    %cst_7 = arith.constant 5.000000e-01 : f32
    %11 = vector.broadcast %cst_7 : f32 to vector<8x128xf32>
    %12 = arith.mulf %10, %11 : vector<8x128xf32>
    %c8 = arith.constant 8 : index
    %c0_8 = arith.constant 0 : index
    %13 = vector.load %arg5[%c8, %c0_8] : memref<32x128xf32, #tpu.memory_space<vmem>>, vector<8x128xf32>
    tpu.vector_store %arg5[%c8, %c0_8], %12 {strides = array<i32>} : memref<32x128xf32, #tpu.memory_space<vmem>>, vector<8x128xf32>,
    %cst_9 = arith.constant 1.500000e+00 : f32
    %14 = vector.broadcast %cst_9 : f32 to vector<8x128xf32>
    %15 = arith.mulf %14, %4 : vector<8x128xf32>
    %cst_10 = arith.constant 0.000000e+00 : f32
    %16 = vector.broadcast %cst_10 : f32 to vector<8x128xf32>
    %17 = arith.addf %15, %16 : vector<8x128xf32>
    %18 = arith.mulf %17, %12 : vector<8x128xf32>
    %cst_11 = arith.constant -3.750000e-01 : f32
    %19 = vector.broadcast %cst_11 : f32 to vector<8x128xf32>
    %20 = arith.mulf %19, %5 : vector<8x128xf32>
    %21 = arith.addf %18, %20 : vector<8x128xf32>
    %c16 = arith.constant 16 : index
    %c0_12 = arith.constant 0 : index
    %22 = vector.load %arg5[%c16, %c0_12] : memref<32x128xf32, #tpu.memory_space<vmem>>, vector<8x128xf32>
    tpu.vector_store %arg5[%c16, %c0_12], %21 {strides = array<i32>} : memref<32x128xf32, #tpu.memory_space<vmem>>, vector<8x128xf32>,
    %cst_13 = arith.constant 1.66666663 : f32
    %23 = vector.broadcast %cst_13 : f32 to vector<8x128xf32>
    %24 = arith.mulf %23, %4 : vector<8x128xf32>
    %cst_14 = arith.constant 0.000000e+00 : f32
    %25 = vector.broadcast %cst_14 : f32 to vector<8x128xf32>
    %26 = arith.addf %24, %25 : vector<8x128xf32>
    %27 = arith.mulf %26, %21 : vector<8x128xf32>
    %cst_15 = arith.constant -6.250000e-01 : f32
    %28 = vector.broadcast %cst_15 : f32 to vector<8x128xf32>
    %29 = arith.mulf %28, %12 : vector<8x128xf32>
    %30 = arith.addf %27, %29 : vector<8x128xf32>
    %c24 = arith.constant 24 : index
    %c0_16 = arith.constant 0 : index
    %31 = vector.load %arg5[%c24, %c0_16] : memref<32x128xf32, #tpu.memory_space<vmem>>, vector<8x128xf32>
    tpu.vector_store %arg5[%c24, %c0_16], %30 {strides = array<i32>} : memref<32x128xf32, #tpu.memory_space<vmem>>, vector<8x128xf32>,
    %c0_17 = arith.constant 0 : index
    %c0_18 = arith.constant 0 : index
    %32 = vector.load %arg3[%c0_17, %c0_18] : memref<8x32xf32, #tpu.memory_space<vmem>>, vector<8x32xf32>
    %c0_19 = arith.constant 0 : index
    %c0_20 = arith.constant 0 : index
    %33 = vector.load %arg5[%c0_19, %c0_20] : memref<32x128xf32, #tpu.memory_space<vmem>>, vector<32x128xf32>
    %cst_21 = arith.constant dense<0.000000e+00> : vector<8x128xf32>
    %34 = tpu.matmul %32, %33, %cst_21 {dimension_numbers = #tpu.dot_dimension_numbers<[1], [0], [0], [1], [0, 0, 1, 1], [], []>} : vector<8x32xf32>, vector<32x128xf32>, vector<8x128xf32> -> vector<8x128xf32>
    %c0_22 = arith.constant 0 : index
    %c0_23 = arith.constant 0 : index
    %c0_24 = arith.constant 0 : index
    %35 = vector.load %arg4[%c0_22, %c0_23, %c0_24] : memref<1x8x128xf32, #tpu.memory_space<vmem>>, vector<1x8x128xf32>
    %36 = vector.shape_cast %35 : vector<1x8x128xf32> to vector<8x128xf32>
    %37 = vector.shape_cast %34 : vector<8x128xf32> to vector<1x8x128xf32>
    tpu.vector_store %arg4[%c0_22, %c0_23, %c0_24], %37 {strides = array<i32>} : memref<1x8x128xf32, #tpu.memory_space<vmem>>, vector<1x8x128xf32>,
    return
  }
  func.func @transform_0(%arg0: i32, %arg1: i32) -> (i32, i32, i32) {
    %c0_i32 = arith.constant 0 : i32
    %c0_i32_0 = arith.constant 0 : i32
    return %arg0, %c0_i32, %arg1 : i32, i32, i32
  }
  func.func @transform_1(%arg0: i32, %arg1: i32) -> (i32, i32) {
    %c0_i32 = arith.constant 0 : i32
    %c0_i32_0 = arith.constant 0 : i32
    %c0_i32_1 = arith.constant 0 : i32
    return %c0_i32, %c0_i32_0 : i32, i32
  }
  func.func @transform_2(%arg0: i32, %arg1: i32) -> (i32, i32, i32) {
    %c0_i32 = arith.constant 0 : i32
    %c0_i32_0 = arith.constant 0 : i32
    return %arg0, %c0_i32, %arg1 : i32, i32, i32
  }
}

</mosaic_0001>

<bundles_post_ra>
// kernel: tpu_custom_call.1
= control target key start
LH: loop header
LB: loop body
LE: loop exit
PB: predicated region body
PF: predicated region fallthrough
CT: control target
= control target key end

     0   :  { %s958_s0 = inlined_call_operand.hbm [shape: f32[2,4,640], index: 0, kind: input, shape index: {}]   ;;  %s959_s1 = inlined_call_operand.hbm [shape: f32[8,32], index: 1, kind: input, shape index: {}]   ;;  %s960_s2 = inlined_call_operand.hbm [shape: f32[2,8,640], index: 2, kind: output, shape index: {}]  }
   0x1   :  { %967 = sst [smem:[#allocation14_spill]] %s959_s1 }
   0x2   :  { %7 = vsyncpa [#allocation4], 0 }
   0x3   :  { %9 = vsyncpa [#allocation4 + $0x1], 0 }
   0x4   :  { %10 = vsyncpa [#allocation7], 0 }
   0x5   :  { %11 = vsyncpa [#allocation5], 0 }
   0x6   :  { %13 = vsyncpa [#allocation5 + $0x1], 0  ;;  %s719_s9 = smov 0   ;;  %s721_s10 = smov 0  }
   0x7   :  { %s723_s11 = smov 0   ;;  %s725_s12 = smov 0  }
   0x8   :  { %s727_s13 = smov 0   ;;  %s729_s14 = smov 0  }
   0x9   :  { %s731_s15 = smov 0   ;;  %s733_s16 = smov 0  }
   0xa LB: > { %s400_s17 = sadd.s32 4294967295, %s695_s16   ;;  %s401_s18 = sadd.s32 4294967294, %s695_s16   ;;  %s695_s16 = sphi %s733_s16, %s19_s16   ;;  %s691_s15 = sphi %s731_s15, %s993_s15   ;;  %s687_s14 = sphi %s729_s14, %s992_s14   ;;  %s683_s13 = sphi %s727_s13, %s991_s13   ;;  %s679_s12 = sphi %s725_s12, %s990_s12   ;;  %s675_s11 = sphi %s723_s11, %s989_s11   ;;  %s671_s10 = sphi %s721_s10, %s988_s10   ;;  %s667_s9 = sphi %s719_s9, %s987_s9  }
   0xb   : > { %p53_p0 = scmp.ne.s32.totalorder %s671_s10, %s667_s9  ;;  %p763_p1 = scmp.eq.s32.totalorder %s400_s17, 0 }
   0xc   : > { %p767_p2 = scmp.eq.s32.totalorder %s400_s17, 9  ;;  %p106_p3 = scmp.eq.s32.totalorder %s401_s18, 9 }
   0xd   : > { %s968_s19 = scalar_select %p763_p1, 1, 0 }
   0xe   : > { %s969_s20 = scalar_select %p767_p2, 1, 0 }
   0xf   : > { %p773_p4 = por %p763_p1, %p53_p0  ;;  %p402_p5 = scmp.ge.s32.totalorder %s695_s16, 1 }
  0x10   : > { %p778_p6 = por %p106_p3, %p53_p0  ;;  %p113_p7 = scmp.lt.s32.totalorder %s695_s16, 11 }
  0x11   : > { %s970_s21 = scalar_select %p773_p4, 1, 0 }
  0x12   : > { %s971_s22 = scalar_select %p778_p6, 1, 0 }
  0x13   : > { %p783_p8 = pnand %p402_p5, %p113_p7  ;;  %s697_s24 = smov [#allocation6]  }
  0x14   : > { %972 = sst [smem:[#allocation12_spill]] %s971_s22  ;;  %s126_s25 = sshll.u32 %s697_s24, 4  ;;  %s127_s25 = int_to_ptr.vmem [resolvable:$true] %s126_s25 }
  0x15   : > { %s973_s23 = scalar_select %p783_p8, 1, 0 }
  0x16   : > { %p448_p9 = pneg %p783_p8  ;;  %s28_s27 = sadd.s32 1, %s687_s14 }
  0x17   : > { %s975_s1 = sld [smem:[#allocation14_spill]] }
  0x18   : > { %p791_p10 = pnand %p448_p9, %p763_p1 }
  0x1a   : > { %p537_p12 = pneg %p791_p10 }
  0x1d   : > { %s535_s30 = scalar_lea.hbm %s975_s1, 128 }
  0x1e   : > { %p536_p11 = scmp.ne.s32.totalorder %s975_s1, %s535_s30  ;;  %p542_p3 = scmp.lt.u32.totalorder %s535_s30, %s975_s1 }
  0x20   : > { %p538_p13 = pnand %p537_p12, %p536_p11 }
  0x22   : > { %p539_p0 = pneg %p538_p13 }
  0x24   : > { %p544_p5 = pnand %p542_p3, %p539_p0 }
  0x26   : > { %547 = shalt.err (!%p544_p5)
}
  0x27   : > { %s548_s7 = scalar_lea.vmem %s127_s25, 128  ;;  %p556_p1 = scmp.lt.s32.totalorder %s127_s25, %s127_s25 }
  0x28   : > { %p549_p7 = scmp.ne.s32.totalorder %s127_s25, %s548_s7  ;;  %p557_p4 = scmp.lt.s32.totalorder %s548_s7, %s548_s7 }
  0x2a   : > { %p551_p9 = pnand %p549_p7, %p537_p12  ;;  %p558_p8 = por %p557_p4, %p556_p1 }
  0x2c   : > { %p552_p6 = pneg %p551_p9 }
  0x2e   : > { %p559_p2 = pnand %p558_p8, %p552_p6 }
  0x30   : > { %562 = shalt.err (!%p559_p2)
}
  0x31   : > { %451 = dma.hbm_to_vmem [thread:$0]  (!%p791_p10), %s975_s1, 128, %s127_s25, [#allocation7]  }
  0x32   : > { %p29_p1 = scmp.ge.s32.totalorder %s28_s27, 5  ;;  %s31_s18 = sadd.s32 1, %s691_s15 }
  0x33   : > { %s40_s24 = sadd.s32 1, %s675_s11  ;;  %p47_p2 = scmp.ne.s32.totalorder %s675_s11, %s671_s10 }
  0x34   : > { %s995_s27 = smov (%p29_p1, %s28_s27), 0  ;;  %s997_s18 = smov (!%p29_p1, %s31_s18), %s691_s15 }
  0x35   : > { %976 = sst [smem:[#allocation13_spill]] %s995_s27  ;;  %s36_s26 = ssub.s32 %s687_s14, %s995_s27 }
  0x36   : > { %p48_p4 = scmp.eq.s32.totalorder %s695_s16, 0  ;;  %p33_p6 = scmp.ge.s32.totalorder %s997_s18, 2 }
  0x37   : > { %p977_p8 = scmp.ne.s32.totalorder %s969_s20, 0  ;;  %p461_p12 = scmp.lt.s32.totalorder %s695_s16, 10 }
  0x38   : > { %p828_p10 = por %p48_p4, %p47_p2  ;;  %s999_s18 = smov (%p33_p6, %s997_s18), 0 }
  0x39   : > { %p824_p11 = por %p977_p8, %p47_p2  ;;  %s137_s29 = sand.u32 1, %s675_s11  }
  0x3a   : > { %s438_s30 = smul.u32 5, %s691_s15  ;;  %s35_s3 = ssub.s32 %s691_s15, %s999_s18 }
  0x3b   : > { %s37_s4 = sor.u32 %s36_s26, %s35_s3  ;;  %s405_s5 = sshll.u32 %s137_s29, 2 }
  0x3c   : > { %p38_p13 = scmp.eq.s32.totalorder %s37_s4, 0  ;;  %s146_s20 = sadd.s32 %s687_s14, %s438_s30 }
  0x3d   : > { %s141_s6 = scalar_lea.vmem [#allocation3], %s405_s5  ;;  %s406_s17 = sshll.u32 %s146_s20, 6 }
  0x3e   : > { %s150_s7 = sshll.u32 %s141_s6, 4  ;;  %s848_s22 = scalar_lea.hbm %s958_s0, %s406_s17  ;;  %s843_s7 = int_to_ptr.vmem [resolvable:$true] %s150_s7 }
  0x3f   : > { %s841_s8 = scalar_select %p38_p13, %s675_s11, %s40_s24  }
  0x40   : > { %p854_p0 = pnand %p461_p12, %p828_p10  ;;  %s138_s24 = scalar_lea.sflag [#allocation4], %s137_s29 }
  0x41   : > { %s563_s30 = scalar_lea.hbm %s848_s22, 64  ;;  %s568_s25 = scalar_lea.hbm %s958_s0, 640 }
  0x42   : > { %p564_p3 = scmp.ne.s32.totalorder %s848_s22, %s563_s30  ;;  %p565_p5 = pneg %p854_p0 }
  0x43   : > { %p569_p1 = scmp.lt.u32.totalorder %s848_s22, %s958_s0  ;;  %p570_p2 = scmp.lt.u32.totalorder %s568_s25, %s563_s30 }
  0x44   : > { %p566_p7 = pnand %p565_p5, %p564_p3  ;;  %p572_p6 = scmp.lt.u32.totalorder %s563_s30, %s848_s22 }
  0x45   : > { %p571_p4 = por %p570_p2, %p569_p1 }
  0x46   : > { %p567_p9 = pneg %p566_p7 }
  0x47   : > { %p573_p8 = por %p572_p6, %p571_p4 }
  0x49   : > { %p574_p10 = pnand %p573_p8, %p567_p9 }
  0x4b   : > { %577 = shalt.err (!%p574_p10)
}
  0x4c   : > { %s578_s29 = scalar_lea.vmem %s843_s7, 64  ;;  %s698_s5 = smov [#allocation3]  }
  0x4d   : > { %p579_p12 = scmp.ne.s32.totalorder %s843_s7, %s578_s29  ;;  %s583_s20 = sshll.u32 %s698_s5, 4  ;;  %s584_s20 = int_to_ptr.vmem [resolvable:$false] %s583_s20 }
  0x4e   : > { %s585_s6 = scalar_lea.vmem %s584_s20, 128  ;;  %p586_p7 = scmp.lt.s32.totalorder %s843_s7, %s584_s20 }
  0x4f   : > { %p581_p13 = pnand %p579_p12, %p565_p5  ;;  %p587_p1 = scmp.lt.s32.totalorder %s585_s6, %s578_s29 }
  0x51   : > { %p582_p3 = pneg %p581_p13  ;;  %p588_p2 = por %p587_p1, %p586_p7 }
  0x53   : > { %p589_p4 = pnand %p588_p2, %p582_p3 }
  0x55   : > { %592 = shalt.err (!%p589_p4)
}
  0x56   : > { %455 = dma.hbm_to_vmem [thread:$0]  (!%p854_p0), %s848_s22, 64, %s843_s7, %s138_s24  }
  0x57   : > { %p981_p9 = scmp.ne.s32.totalorder %s973_s23, 0 }
  0x58   : > { %s886_s17 = sand.u32 (!%p981_p9), 1, %s671_s10   ;;  %p982_p5 = scmp.ne.s32.totalorder (!%p981_p9), %s970_s21, 0 }
  0x59   : > { %159 = sbr.rel (%p981_p9) target bundleno = 355 (0x163), region = 28  ;;  %s408_s30 = sshll.u32 (!%p981_p9), %s886_s17, 2 }
  0x5a   : > { %s162_s1 = scalar_lea.sflag (!%p981_p9), [#allocation4], %s886_s17  ;;  %s165_s27 = scalar_lea.vmem (!%p981_p9), [#allocation3], %s408_s30 }
  0x60   : > { %654 = dma.done.wait (%p982_p5), %s162_s1, 64  }
  0x61   : > { %656 = vsyncadd (%p982_p5), %s162_s1, 4294967232  ;;  %p983_p6 = scmp.ne.s32.totalorder %s968_s19, 0 }
  0x63   : > { %658 = dma.done.wait (%p983_p6), [#allocation7], 128  }
  0x64   : > { %660 = vsyncadd (%p983_p6), [#allocation7], 4294967168  ;;  %v699_v0 = vmov 0.0|0.0   ;;  %vm700_vm0 = vmmov 0   ;;  %v701_v1 = vmov 0.0   ;;  %vm192_vm1 = vcmask 1043456  }
  0x65   : > { %432 = vmatprep.subr.bf16.mxu0 %v699_v0  ;;  %429 = vmatprep.mubr.msk.f32.mxu0 %vm700_vm0, %v701_v1  ;;  %v190_v2 = vld [vmem:[%s165_s27] sm:$0xf]  ;;  %v702_v7 = vmov 1.0   ;;  %v209_v16 = vld [vmem:[#allocation6] sm:$0xff]  ;;  %vm214_vm2 = vcmask 261120   ;;  %s410_s19 = sshll.u32 %s886_s17, 3 }
  0x66   : > { %533 = vtanh.f32 %v190_v2  ;;  %s439_s21 = smul.u32 5, %s683_s13  ;;  %s189_s23 = scalar_lea.vmem [#allocation8], %s410_s19 }
  0x67   : > { %s305_s7 = sshll.u32 %s189_s23, 4  ;;  %s290_s4 = scalar_lea.sflag [#allocation5], %s886_s17  ;;  %s901_s7 = int_to_ptr.vmem [resolvable:$true] %s305_s7 }
  0x68   : > { %s301_s22 = sadd.s32 %s679_s12, %s439_s21  ;;  %s593_s29 = scalar_lea.vmem %s901_s7, 128 }
  0x69   : > { %s413_s26 = sshll.u32 %s301_s22, 7  ;;  %p594_p0 = scmp.ne.s32.totalorder %s901_s7, %s593_s29 }
  0x6a   : > { %s906_s3 = scalar_lea.hbm %s960_s2, %s413_s26  ;;  %s703_s12 = smov [#allocation8]  }
  0x6b   : > { %p595_p8 = pnand %p594_p0, %p824_p11  ;;  %s597_s13 = sshll.u32 %s703_s12, 4  ;;  %s598_s13 = int_to_ptr.vmem [resolvable:$false] %s597_s13 }
  0x6c   : > { %s599_s5 = scalar_lea.vmem %s598_s13, 256  ;;  %p600_p12 = scmp.lt.s32.totalorder %s901_s7, %s598_s13 }
  0x6d   : > { %p596_p10 = pneg %p595_p8  ;;  %p601_p13 = scmp.lt.s32.totalorder %s599_s5, %s593_s29 }
  0x6f   : > { %p602_p3 = por %p601_p13, %p600_p12 }
  0x70   : > { %v534_v3 = vpop.eup %533 }
  0x71   : > { %v193_v4 = vsel %vm192_vm1, %v534_v3, 0.0  ;;  %p603_p7 = pnand %p602_p3, %p596_p10 }
  0x72   : > { %v196_v5 = vmul.f32 0.5, %v193_v4  ;;  %v198_v6 = vmul.f32 1.5, %v193_v4  ;;  %v203_v10 = vmul.f32 1.6666666, %v193_v4 }
  0x74   : > { %v433_v8 = vpack.c.bf16 %v196_v5, %v702_v7  ;;  %v200_v9 = vmul.f32 %v198_v6, %v196_v5  ;;  %v206_v12 = vmul.f32 -0.625, %v196_v5 }
  0x76   : > { %434 = vmatpush3.bf16.msra.mxu0 %v433_v8  ;;  %v201_v11 = vadd.f32 -0.375, %v200_v9 }
  0x77   : > { %435 = vmatprep.subr.bf16.mxu0 %v699_v0 }
  0x78   : > { %v205_v13 = vmul.f32 %v203_v10, %v201_v11 }
  0x7a   : > { %v207_v14 = vadd.f32 %v206_v12, %v205_v13 }
  0x7c   : > { %v436_v15 = vpack.c.bf16 %v207_v14, %v201_v11 }
  0x7e   : > { %437 = vmatpush3.bf16.msra.mxu0 %v436_v15 }
  0x81   : > { %430 = vmatmul.mubr.msk.f32.vlgmr.msra.gmra.mrb[0].mxu0 %vm214_vm2, %v209_v16 }
 0x154   : > { %v284_v17 = vpop.f32.mrb[0].mxu0 }
 0x155   : > { %288 = vst [vmem:[%s189_s23] sm:$0xff] %v284_v17  ;;  %v431_v18 = vpop.f32.mrb[1].mxu0 }
 0x156   : > { %606 = shalt.err (!%p603_p7)
}
 0x157   : > { %s607_s20 = scalar_lea.hbm %s906_s3, 128  ;;  %s611_s30 = scalar_lea.hbm %s960_s2, 1280 }
 0x158   : > { %p608_p1 = scmp.ne.s32.totalorder %s906_s3, %s607_s20  ;;  %p612_p9 = scmp.lt.u32.totalorder %s906_s3, %s960_s2 }
 0x159   : > { %p613_p5 = scmp.lt.u32.totalorder %s611_s30, %s607_s20  ;;  %p615_p0 = scmp.lt.u32.totalorder %s607_s20, %s906_s3 }
 0x15a   : > { %p609_p2 = pnand %p608_p1, %p824_p11 }
 0x15b   : > { %p614_p6 = por %p613_p5, %p612_p9 }
 0x15c   : > { %p610_p4 = pneg %p609_p2 }
 0x15d   : > { %p616_p8 = por %p615_p0, %p614_p6 }
 0x15f   : > { %p617_p10 = pnand %p616_p8, %p610_p4 }
 0x161   : > { %620 = shalt.err (!%p617_p10)
}
 0x162   : > { %446 = dma.vmem_to_hbm [thread:$0]  (%p824_p11), %s901_s7, 128, %s906_s3, %s290_s4  }
 0x163 PF: > { %s984_s19 = sld [smem:[#allocation12_spill]]  ;;  %p463_p12 = scmp.ge.s32.totalorder %s695_s16, 2 }
 0x164   : > { %s317_s21 = sand.u32 1, %s667_s9  }
 0x165   : > { %s318_s22 = scalar_lea.sflag [#allocation5], %s317_s21 }
 0x169   : > { %p985_p13 = scmp.ne.s32.totalorder %s984_s19, 0 }
 0x16b   : > { %p457_p3 = pnand %p463_p12, %p985_p13 }
 0x16d   : > { %662 = dma.done.wait (!%p457_p3), %s318_s22, 128  }
 0x16e   : > { %664 = vsyncadd (!%p457_p3), %s318_s22, 4294967168  ;;  %s19_s16 = sadd.s32 1, %s695_s16   ;;  %s986_s28 = sld [smem:[#allocation13_spill]] }
 0x16f   : > { %p16_p7 = scmp.ge.s32.totalorder %s19_s16, 12   ;;  %s987_s9 = smov %s671_s10 }
 0x170   : > { %s988_s10 = smov %s675_s11  ;;  %s989_s11 = smov %s841_s8 }
 0x171   : > { %s990_s12 = smov %s687_s14  ;;  %s991_s13 = smov %s691_s15 }
 0x172   : > { %s993_s15 = smov %s999_s18  ;;  %18 = sbr.rel (!%p16_p7) target bundleno = 10 (0xa), region = 77 }
 0x174   : > { %s992_s14 = smov %s986_s28 }
 0x179   :  { %323 = vsyncpa [#allocation4], 1 }
 0x17a   :  { %325 = vsyncpa [#allocation4 + $0x1], 1 }
 0x17b   :  { %326 = vsyncpa [#allocation7], 1 }
 0x17c   :  { %327 = vsyncpa [#allocation5], 1 }
 0x17d   :  { %329 = vsyncpa [#allocation5 + $0x1], 1 }

</bundles_post_ra>
